<compile_context>
chip_gen: v6e
topology: v6e:2x2x1
jax: 0.10.0
libtpu: 0.0.40
codegen_flags: <defaults>
</compile_context>

<pallas_src>
import jax
import jax.numpy as jnp
from jax import lax
from jax.experimental import pallas as pl
from jax.experimental.pallas import tpu as pltpu

# ----------------------------- config --------------------------------------
BATCH = 2
SEQ = 8
EMBED = 32
HEADS = 4
HEAD_DIM = EMBED // HEADS
FWD_EXP = 4
HIDDEN = EMBED * FWD_EXP            # 128 (== 4*EMBED; packing below relies on this)
EPS = 1e-5
BS = BATCH * SEQ                    # 16

assert HIDDEN == 4 * EMBED, "weight-slab packing assumes hidden == 4*embed"


# ----------------------------- kernel --------------------------------------
def _encoder_block_kernel(x_ref, bias_ref, wa_ref, w2_ref, vec_ref, out_ref):
    # x_ref   : (3*BS, E)   rows 0:BS = q, BS:2BS = k, 2BS:3BS = v
    # bias_ref: (BS, BS)    additive attention bias (batch blocking + key mask)
    # wa_ref  : (2E, 4E)    rows 0:E  -> [wq|wk|wv|wo], rows E:2E -> w1
    # w2_ref  : (H, E)
    # vec_ref : (4, H)      row0=[bq|bk|bv|bo] row1=[g1|be1|g2|be2] row2=fb1 row3=[fb2|0]
    x = x_ref[...]                                    # (48, 32)
    vec = vec_ref[...]                                # (4, 128)

    bqkv = vec[0:1, 0:3 * EMBED]                      # (1, 96)
    bo = vec[0:1, 3 * EMBED:4 * EMBED]                # (1, 32)
    g1 = vec[1:2, 0:EMBED]
    be1 = vec[1:2, EMBED:2 * EMBED]
    g2 = vec[1:2, 2 * EMBED:3 * EMBED]
    be2 = vec[1:2, 3 * EMBED:4 * EMBED]
    fb1 = vec[2:3, :]                                 # (1, 128)
    fb2 = vec[3:4, 0:EMBED]                           # (1, 32)

    wqkv = wa_ref[0:EMBED, 0:3 * EMBED]               # (32, 96)
    w1 = wa_ref[EMBED:2 * EMBED, :]                   # (32, 128)

    # --- fused Q/K/V projection: one MXU call on the stacked activations ---
    # Only the "diagonal" blocks of the (48, 96) result are used:
    #   rows 0:BS  cols 0:E    -> Q = q @ wq
    #   rows BS:2BS cols E:2E  -> K = k @ wk
    #   rows 2BS:  cols 2E:3E  -> V = v @ wv
    qkv = jnp.dot(x, wqkv, preferred_element_type=jnp.float32) + bqkv

    bias = bias_ref[...]                              # (16, 16) f32 additive
    scale = 1.0 / (float(HEAD_DIM) ** 0.5)

    # --- per-head attention; batch handled by the block-diagonal bias ---
    attn = jnp.zeros((BS, EMBED), jnp.float32)
    for h in range(HEADS):
        c = h * HEAD_DIM
        Qh = qkv[0:BS, c:c + HEAD_DIM]                            # (16, 8)
        Kh = qkv[BS:2 * BS, EMBED + c:EMBED + c + HEAD_DIM]       # (16, 8)
        Vh = qkv[2 * BS:3 * BS, 2 * EMBED + c:2 * EMBED + c + HEAD_DIM]

        # scores = Qh . Kh^T without materializing a transpose
        e = lax.dot_general(Qh, Kh, (((1,), (1,)), ((), ())),
                            preferred_element_type=jnp.float32) * scale + bias
        e = e - jnp.max(e, axis=-1, keepdims=True)
        p = jnp.exp(e)
        a = p * pl.reciprocal(jnp.sum(p, axis=-1, keepdims=True), approx=True)

        ctx = jnp.dot(a, Vh, preferred_element_type=jnp.float32)  # (16, 8)
        wo_h = wa_ref[c:c + HEAD_DIM, 3 * EMBED:4 * EMBED]        # (8, 32) rows of Wo
        attn = attn + jnp.dot(ctx, wo_h, preferred_element_type=jnp.float32)

    # --- residual + LayerNorm1 (dropout = identity) ---
    q_res = x[0:BS, :]
    y = attn + bo + q_res
    mu = jnp.mean(y, axis=-1, keepdims=True)
    var = jnp.mean((y - mu) ** 2, axis=-1, keepdims=True)
    x1 = (y - mu) * lax.rsqrt(var + EPS) * g1 + be1

    # --- feed-forward ---
    h1 = jnp.dot(x1, w1, preferred_element_type=jnp.float32) + fb1
    h1 = jnp.maximum(h1, 0.0)
    ff = jnp.dot(h1, w2_ref[...], preferred_element_type=jnp.float32) + fb2

    # --- residual + LayerNorm2 (dropout = identity) ---
    z = x1 + ff
    mu2 = jnp.mean(z, axis=-1, keepdims=True)
    var2 = jnp.mean((z - mu2) ** 2, axis=-1, keepdims=True)
    out = (z - mu2) * lax.rsqrt(var2 + EPS) * g2 + be2

    out_ref[...] = out.astype(out_ref.dtype)


# ----------------------------- wrapper --------------------------------------
@jax.jit
def encoder_block(q, k, v, mask, params):
    (wq, bq, wk, bk, wv, bv, wo, bo,
     g1, be1, w1, fb1, w2, fb2, g2, be2) = params
    B, S, E = q.shape
    bs = B * S

    # Pack weights: (2E, 4E) slab = [[wq|wk|wv|wo], [w1]]; w2 stays (H, E).
    wa = jnp.concatenate(
        [jnp.concatenate([wq, wk, wv, wo], axis=1), w1], axis=0)

    # Pack all bias / LayerNorm vectors into one (4, HIDDEN) slab.
    vecs = jnp.concatenate([
        jnp.concatenate([bq, bk, bv, bo], axis=1),
        jnp.concatenate([g1, be1, g2, be2], axis=1),
        fb1,
        jnp.concatenate([fb2, jnp.zeros((1, HIDDEN - E), fb2.dtype)], axis=1),
    ], axis=0)

    # Fold batch into M and row-stack q/k/v activations.
    x = jnp.concatenate(
        [q.reshape(bs, E), k.reshape(bs, E), v.reshape(bs, E)], axis=0)

    # Additive attention bias: -1e9 for masked keys AND for cross-batch pairs
    # (block-diagonalizes the folded batch), 0 elsewhere.
    same_batch = (jnp.arange(B)[:, None, None, None] ==
                  jnp.arange(B)[None, None, :, None])               # (B,1,B,1)
    allow = same_batch & (mask != 0)[None, None, :, :]               # (B,1,B,S)
    allow = jnp.broadcast_to(allow, (B, S, B, S)).reshape(bs, bs)
    attn_bias = jnp.where(allow, 0.0, -1e9).astype(jnp.float32)

    out = pl.pallas_call(
        _encoder_block_kernel,
        out_shape=jax.ShapeDtypeStruct((bs, E), q.dtype),
        compiler_params=pltpu.CompilerParams(vmem_limit_bytes=32 * 1024 * 1024),
    )(x, attn_bias, wa, w2, vecs)
    return out.reshape(B, S, E)


# ----------------------------- pure-JAX reference ----------------------------
def encoder_block_ref(q, k, v, mask, params):
    (wq, bq, wk, bk, wv, bv, wo, bo,
     g1, be1, w1, fb1, w2, fb2, g2, be2) = params
    B, S, E = q.shape
    Q = q @ wq + bq
    K = k @ wk + bk
    V = v @ wv + bv
    Qh = Q.reshape(B, S, HEADS, HEAD_DIM).transpose(0, 2, 1, 3)
    Kh = K.reshape(B, S, HEADS, HEAD_DIM).transpose(0, 2, 1, 3)
    Vh = V.reshape(B, S, HEADS, HEAD_DIM).transpose(0, 2, 1, 3)
    e = jnp.einsum("bhqd,bhkd->bhqk", Qh, Kh) / jnp.sqrt(jnp.float32(HEAD_DIM))
    e = jnp.where(mask[:, None, None, :] == 0, -1e9, e)
    a = jax.nn.softmax(e, axis=-1)
    ctx = jnp.einsum("bhqk,bhkd->bhqd", a, Vh).transpose(0, 2, 1, 3).reshape(B, S, E)
    attn_out = ctx @ wo + bo

    def ln(x, g, b):
        mu = jnp.mean(x, axis=-1, keepdims=True)
        var = jnp.mean((x - mu) ** 2, axis=-1, keepdims=True)
        return (x - mu) * lax.rsqrt(var + EPS) * g + b

    x1 = ln(attn_out + q, g1, be1)
    ff = jnp.maximum(x1 @ w1 + fb1, 0.0) @ w2 + fb2
    return ln(x1 + ff, g2, be2)


# ----------------------------- param init -----------------------------------
def init_params(key):
    ks = jax.random.split(key, 8)
    s = 0.05
    wq = jax.random.normal(ks[0], (EMBED, EMBED), jnp.float32) * s
    wk = jax.random.normal(ks[1], (EMBED, EMBED), jnp.float32) * s
    wv = jax.random.normal(ks[2], (EMBED, EMBED), jnp.float32) * s
    wo = jax.random.normal(ks[3], (EMBED, EMBED), jnp.float32) * s
    bq = jax.random.normal(ks[4], (1, EMBED), jnp.float32) * s
    bk = jnp.zeros((1, EMBED), jnp.float32)
    bv = jnp.zeros((1, EMBED), jnp.float32)
    bo = jnp.zeros((1, EMBED), jnp.float32)
    g1 = jnp.ones((1, EMBED), jnp.float32)
    be1 = jnp.zeros((1, EMBED), jnp.float32)
    w1 = jax.random.normal(ks[5], (EMBED, HIDDEN), jnp.float32) * s
    fb1 = jax.random.normal(ks[6], (1, HIDDEN), jnp.float32) * s
    w2 = jax.random.normal(ks[7], (HIDDEN, EMBED), jnp.float32) * s
    fb2 = jnp.zeros((1, EMBED), jnp.float32)
    g2 = jnp.ones((1, EMBED), jnp.float32)
    be2 = jnp.zeros((1, EMBED), jnp.float32)
    return (wq, bq, wk, bk, wv, bv, wo, bo,
            g1, be1, w1, fb1, w2, fb2, g2, be2)


# ----------------------------- main ------------------------------------------
if __name__ == "__main__":
    key = jax.random.PRNGKey(0)
    kq, kk, kv, kp = jax.random.split(key, 4)

    q = jax.random.normal(kq, (BATCH, SEQ, EMBED), jnp.float32)
    k = jax.random.normal(kk, (BATCH, SEQ, EMBED), jnp.float32)
    v = jax.random.normal(kv, (BATCH, SEQ, EMBED), jnp.float32)
    # mask: 1 = attend, 0 = masked; mask out last two keys of second example.
    mask = jnp.ones((BATCH, SEQ), jnp.int32).at[1, SEQ - 2:].set(0)

    params = init_params(kp)

    out = encoder_block(q, k, v, mask, params)
    out = jax.block_until_ready(out)

    ref = encoder_block_ref(q, k, v, mask, params)
    assert out.shape == (BATCH, SEQ, EMBED)
    # Tolerance loosened slightly vs. f32-exact because of the EUP approximate
    # reciprocal in the softmax denominator (~1e-4 relative error).
    max_err = float(jnp.max(jnp.abs(out - ref)))
    assert jnp.allclose(out, ref, rtol=5e-3, atol=5e-3), f"mismatch vs ref, max_err={max_err}"

    # TODO(synk): nn.Dropout is a no-op here (eval mode); add stateful PRNG
    # dropout via pltpu.prng_seed/prng_random_bits if training semantics needed.
    print("KERNEL_OK")
</pallas_src>

<mosaic_0001>
module attributes {stable_mosaic.version = 11 : i64} {
  func.func @_encoder_block_kernel(%arg0: memref<48x32xf32, #tpu.memory_space<vmem>>, %arg1: memref<16x16xf32, #tpu.memory_space<vmem>>, %arg2: memref<64x128xf32, #tpu.memory_space<vmem>>, %arg3: memref<128x32xf32, #tpu.memory_space<vmem>>, %arg4: memref<4x128xf32, #tpu.memory_space<vmem>>, %arg5: memref<16x32xf32, #tpu.memory_space<vmem>>) attributes {dimension_semantics = [], scalar_prefetch = 0 : i64, scratch_operands = 0 : i64, tpu.core_type = #tpu.core_type<tc>} {
    %c0 = arith.constant 0 : index
    %c0_0 = arith.constant 0 : index
    %0 = vector.load %arg0[%c0, %c0_0] : memref<48x32xf32, #tpu.memory_space<vmem>>, vector<48x32xf32>
    %c0_1 = arith.constant 0 : index
    %c0_2 = arith.constant 0 : index
    %1 = vector.load %arg4[%c0_1, %c0_2] : memref<4x128xf32, #tpu.memory_space<vmem>>, vector<4x128xf32>
    %2 = vector.extract_strided_slice %1 {offsets = [0, 0], sizes = [1, 96], strides = [1, 1]} : vector<4x128xf32> to vector<1x96xf32>
    %3 = vector.extract_strided_slice %1 {offsets = [0, 96], sizes = [1, 32], strides = [1, 1]} : vector<4x128xf32> to vector<1x32xf32>
    %4 = vector.extract_strided_slice %1 {offsets = [1, 0], sizes = [1, 32], strides = [1, 1]} : vector<4x128xf32> to vector<1x32xf32>
    %5 = vector.extract_strided_slice %1 {offsets = [1, 32], sizes = [1, 32], strides = [1, 1]} : vector<4x128xf32> to vector<1x32xf32>
    %6 = vector.extract_strided_slice %1 {offsets = [1, 64], sizes = [1, 32], strides = [1, 1]} : vector<4x128xf32> to vector<1x32xf32>
    %7 = vector.extract_strided_slice %1 {offsets = [1, 96], sizes = [1, 32], strides = [1, 1]} : vector<4x128xf32> to vector<1x32xf32>
    %8 = vector.extract_strided_slice %1 {offsets = [2, 0], sizes = [1, 128], strides = [1, 1]} : vector<4x128xf32> to vector<1x128xf32>
    %9 = vector.extract_strided_slice %1 {offsets = [3, 0], sizes = [1, 32], strides = [1, 1]} : vector<4x128xf32> to vector<1x32xf32>
    %c0_3 = arith.constant 0 : index
    %c0_4 = arith.constant 0 : index
    %10 = vector.load %arg2[%c0_3, %c0_4] : memref<64x128xf32, #tpu.memory_space<vmem>>, vector<32x96xf32>
    %c32 = arith.constant 32 : index
    %c0_5 = arith.constant 0 : index
    %11 = vector.load %arg2[%c32, %c0_5] : memref<64x128xf32, #tpu.memory_space<vmem>>, vector<32x128xf32>
    %cst = arith.constant dense<0.000000e+00> : vector<48x96xf32>
    %12 = tpu.matmul %0, %10, %cst {dimension_numbers = #tpu.dot_dimension_numbers<[1], [0], [0], [1], [0, 0, 1, 1], [], []>} : vector<48x32xf32>, vector<32x96xf32>, vector<48x96xf32> -> vector<48x96xf32>
    %13 = vector.broadcast %2 : vector<1x96xf32> to vector<48x96xf32>
    %14 = arith.addf %12, %13 : vector<48x96xf32>
    %c0_6 = arith.constant 0 : index
    %c0_7 = arith.constant 0 : index
    %15 = vector.load %arg1[%c0_6, %c0_7] : memref<16x16xf32, #tpu.memory_space<vmem>>, vector<16x16xf32>
    %cst_8 = arith.constant 0.000000e+00 : f32
    %16 = vector.broadcast %cst_8 : f32 to vector<16x32xf32>
    %17 = vector.extract_strided_slice %14 {offsets = [0, 0], sizes = [16, 8], strides = [1, 1]} : vector<48x96xf32> to vector<16x8xf32>
    %18 = vector.extract_strided_slice %14 {offsets = [16, 32], sizes = [16, 8], strides = [1, 1]} : vector<48x96xf32> to vector<16x8xf32>
    %19 = vector.extract_strided_slice %14 {offsets = [32, 64], sizes = [16, 8], strides = [1, 1]} : vector<48x96xf32> to vector<16x8xf32>
    %cst_9 = arith.constant dense<0.000000e+00> : vector<16x16xf32>
    %20 = tpu.matmul %17, %18, %cst_9 {dimension_numbers = #tpu.dot_dimension_numbers<[1], [1], [0], [0], [0, 0, 1, 0], [], []>} : vector<16x8xf32>, vector<16x8xf32>, vector<16x16xf32> -> vector<16x16xf32>
    %cst_10 = arith.constant 0.353553385 : f32
    %21 = vector.broadcast %cst_10 : f32 to vector<16x16xf32>
    %22 = arith.mulf %20, %21 : vector<16x16xf32>
    %23 = arith.addf %22, %15 : vector<16x16xf32>
    %cst_11 = arith.constant dense<0xFF800000> : vector<16xf32>
    %24 = vector.multi_reduction <maximumf>, %23, %cst_11 [1] : vector<16x16xf32> to vector<16xf32>
    %25 = vector.shape_cast %24 : vector<16xf32> to vector<16x1xf32>
    %26 = vector.broadcast %25 : vector<16x1xf32> to vector<16x16xf32>
    %27 = arith.subf %23, %26 : vector<16x16xf32>
    %28 = math.exp %27 : vector<16x16xf32>
    %cst_12 = arith.constant dense<0.000000e+00> : vector<16xf32>
    %29 = vector.multi_reduction <add>, %28, %cst_12 [1] : vector<16x16xf32> to vector<16xf32>
    %30 = vector.shape_cast %29 : vector<16xf32> to vector<16x1xf32>
    %31 = tpu.reciprocal %30 {approx = true} : vector<16x1xf32> -> vector<16x1xf32>
    %32 = vector.broadcast %31 : vector<16x1xf32> to vector<16x16xf32>
    %33 = arith.mulf %28, %32 : vector<16x16xf32>
    %cst_13 = arith.constant dense<0.000000e+00> : vector<16x8xf32>
    %34 = tpu.matmul %33, %19, %cst_13 {dimension_numbers = #tpu.dot_dimension_numbers<[1], [0], [0], [1], [0, 0, 1, 1], [], []>} : vector<16x16xf32>, vector<16x8xf32>, vector<16x8xf32> -> vector<16x8xf32>
    %c0_14 = arith.constant 0 : index
    %c96 = arith.constant 96 : index
    %35 = vector.load %arg2[%c0_14, %c96] : memref<64x128xf32, #tpu.memory_space<vmem>>, vector<8x32xf32>
    %cst_15 = arith.constant dense<0.000000e+00> : vector<16x32xf32>
    %36 = tpu.matmul %34, %35, %cst_15 {dimension_numbers = #tpu.dot_dimension_numbers<[1], [0], [0], [1], [0, 0, 1, 1], [], []>} : vector<16x8xf32>, vector<8x32xf32>, vector<16x32xf32> -> vector<16x32xf32>
    %37 = arith.addf %16, %36 : vector<16x32xf32>
    %38 = vector.extract_strided_slice %14 {offsets = [0, 8], sizes = [16, 8], strides = [1, 1]} : vector<48x96xf32> to vector<16x8xf32>
    %39 = vector.extract_strided_slice %14 {offsets = [16, 40], sizes = [16, 8], strides = [1, 1]} : vector<48x96xf32> to vector<16x8xf32>
    %40 = vector.extract_strided_slice %14 {offsets = [32, 72], sizes = [16, 8], strides = [1, 1]} : vector<48x96xf32> to vector<16x8xf32>
    %cst_16 = arith.constant dense<0.000000e+00> : vector<16x16xf32>
    %41 = tpu.matmul %38, %39, %cst_16 {dimension_numbers = #tpu.dot_dimension_numbers<[1], [1], [0], [0], [0, 0, 1, 0], [], []>} : vector<16x8xf32>, vector<16x8xf32>, vector<16x16xf32> -> vector<16x16xf32>
    %cst_17 = arith.constant 0.353553385 : f32
    %42 = vector.broadcast %cst_17 : f32 to vector<16x16xf32>
    %43 = arith.mulf %41, %42 : vector<16x16xf32>
    %44 = arith.addf %43, %15 : vector<16x16xf32>
    %cst_18 = arith.constant dense<0xFF800000> : vector<16xf32>
    %45 = vector.multi_reduction <maximumf>, %44, %cst_18 [1] : vector<16x16xf32> to vector<16xf32>
    %46 = vector.shape_cast %45 : vector<16xf32> to vector<16x1xf32>
    %47 = vector.broadcast %46 : vector<16x1xf32> to vector<16x16xf32>
    %48 = arith.subf %44, %47 : vector<16x16xf32>
    %49 = math.exp %48 : vector<16x16xf32>
    %cst_19 = arith.constant dense<0.000000e+00> : vector<16xf32>
    %50 = vector.multi_reduction <add>, %49, %cst_19 [1] : vector<16x16xf32> to vector<16xf32>
    %51 = vector.shape_cast %50 : vector<16xf32> to vector<16x1xf32>
    %52 = tpu.reciprocal %51 {approx = true} : vector<16x1xf32> -> vector<16x1xf32>
    %53 = vector.broadcast %52 : vector<16x1xf32> to vector<16x16xf32>
    %54 = arith.mulf %49, %53 : vector<16x16xf32>
    %cst_20 = arith.constant dense<0.000000e+00> : vector<16x8xf32>
    %55 = tpu.matmul %54, %40, %cst_20 {dimension_numbers = #tpu.dot_dimension_numbers<[1], [0], [0], [1], [0, 0, 1, 1], [], []>} : vector<16x16xf32>, vector<16x8xf32>, vector<16x8xf32> -> vector<16x8xf32>
    %c8 = arith.constant 8 : index
    %c96_21 = arith.constant 96 : index
    %56 = vector.load %arg2[%c8, %c96_21] : memref<64x128xf32, #tpu.memory_space<vmem>>, vector<8x32xf32>
    %cst_22 = arith.constant dense<0.000000e+00> : vector<16x32xf32>
    %57 = tpu.matmul %55, %56, %cst_22 {dimension_numbers = #tpu.dot_dimension_numbers<[1], [0], [0], [1], [0, 0, 1, 1], [], []>} : vector<16x8xf32>, vector<8x32xf32>, vector<16x32xf32> -> vector<16x32xf32>
    %58 = arith.addf %37, %57 : vector<16x32xf32>
    %59 = vector.extract_strided_slice %14 {offsets = [0, 16], sizes = [16, 8], strides = [1, 1]} : vector<48x96xf32> to vector<16x8xf32>
    %60 = vector.extract_strided_slice %14 {offsets = [16, 48], sizes = [16, 8], strides = [1, 1]} : vector<48x96xf32> to vector<16x8xf32>
    %61 = vector.extract_strided_slice %14 {offsets = [32, 80], sizes = [16, 8], strides = [1, 1]} : vector<48x96xf32> to vector<16x8xf32>
    %cst_23 = arith.constant dense<0.000000e+00> : vector<16x16xf32>
    %62 = tpu.matmul %59, %60, %cst_23 {dimension_numbers = #tpu.dot_dimension_numbers<[1], [1], [0], [0], [0, 0, 1, 0], [], []>} : vector<16x8xf32>, vector<16x8xf32>, vector<16x16xf32> -> vector<16x16xf32>
    %cst_24 = arith.constant 0.353553385 : f32
    %63 = vector.broadcast %cst_24 : f32 to vector<16x16xf32>
    %64 = arith.mulf %62, %63 : vector<16x16xf32>
    %65 = arith.addf %64, %15 : vector<16x16xf32>
    %cst_25 = arith.constant dense<0xFF800000> : vector<16xf32>
    %66 = vector.multi_reduction <maximumf>, %65, %cst_25 [1] : vector<16x16xf32> to vector<16xf32>
    %67 = vector.shape_cast %66 : vector<16xf32> to vector<16x1xf32>
    %68 = vector.broadcast %67 : vector<16x1xf32> to vector<16x16xf32>
    %69 = arith.subf %65, %68 : vector<16x16xf32>
    %70 = math.exp %69 : vector<16x16xf32>
    %cst_26 = arith.constant dense<0.000000e+00> : vector<16xf32>
    %71 = vector.multi_reduction <add>, %70, %cst_26 [1] : vector<16x16xf32> to vector<16xf32>
    %72 = vector.shape_cast %71 : vector<16xf32> to vector<16x1xf32>
    %73 = tpu.reciprocal %72 {approx = true} : vector<16x1xf32> -> vector<16x1xf32>
    %74 = vector.broadcast %73 : vector<16x1xf32> to vector<16x16xf32>
    %75 = arith.mulf %70, %74 : vector<16x16xf32>
    %cst_27 = arith.constant dense<0.000000e+00> : vector<16x8xf32>
    %76 = tpu.matmul %75, %61, %cst_27 {dimension_numbers = #tpu.dot_dimension_numbers<[1], [0], [0], [1], [0, 0, 1, 1], [], []>} : vector<16x16xf32>, vector<16x8xf32>, vector<16x8xf32> -> vector<16x8xf32>
    %c16 = arith.constant 16 : index
    %c96_28 = arith.constant 96 : index
    %77 = vector.load %arg2[%c16, %c96_28] : memref<64x128xf32, #tpu.memory_space<vmem>>, vector<8x32xf32>
    %cst_29 = arith.constant dense<0.000000e+00> : vector<16x32xf32>
    %78 = tpu.matmul %76, %77, %cst_29 {dimension_numbers = #tpu.dot_dimension_numbers<[1], [0], [0], [1], [0, 0, 1, 1], [], []>} : vector<16x8xf32>, vector<8x32xf32>, vector<16x32xf32> -> vector<16x32xf32>
    %79 = arith.addf %58, %78 : vector<16x32xf32>
    %80 = vector.extract_strided_slice %14 {offsets = [0, 24], sizes = [16, 8], strides = [1, 1]} : vector<48x96xf32> to vector<16x8xf32>
    %81 = vector.extract_strided_slice %14 {offsets = [16, 56], sizes = [16, 8], strides = [1, 1]} : vector<48x96xf32> to vector<16x8xf32>
    %82 = vector.extract_strided_slice %14 {offsets = [32, 88], sizes = [16, 8], strides = [1, 1]} : vector<48x96xf32> to vector<16x8xf32>
    %cst_30 = arith.constant dense<0.000000e+00> : vector<16x16xf32>
    %83 = tpu.matmul %80, %81, %cst_30 {dimension_numbers = #tpu.dot_dimension_numbers<[1], [1], [0], [0], [0, 0, 1, 0], [], []>} : vector<16x8xf32>, vector<16x8xf32>, vector<16x16xf32> -> vector<16x16xf32>
    %cst_31 = arith.constant 0.353553385 : f32
    %84 = vector.broadcast %cst_31 : f32 to vector<16x16xf32>
    %85 = arith.mulf %83, %84 : vector<16x16xf32>
    %86 = arith.addf %85, %15 : vector<16x16xf32>
    %cst_32 = arith.constant dense<0xFF800000> : vector<16xf32>
    %87 = vector.multi_reduction <maximumf>, %86, %cst_32 [1] : vector<16x16xf32> to vector<16xf32>
    %88 = vector.shape_cast %87 : vector<16xf32> to vector<16x1xf32>
    %89 = vector.broadcast %88 : vector<16x1xf32> to vector<16x16xf32>
    %90 = arith.subf %86, %89 : vector<16x16xf32>
    %91 = math.exp %90 : vector<16x16xf32>
    %cst_33 = arith.constant dense<0.000000e+00> : vector<16xf32>
    %92 = vector.multi_reduction <add>, %91, %cst_33 [1] : vector<16x16xf32> to vector<16xf32>
    %93 = vector.shape_cast %92 : vector<16xf32> to vector<16x1xf32>
    %94 = tpu.reciprocal %93 {approx = true} : vector<16x1xf32> -> vector<16x1xf32>
    %95 = vector.broadcast %94 : vector<16x1xf32> to vector<16x16xf32>
    %96 = arith.mulf %91, %95 : vector<16x16xf32>
    %cst_34 = arith.constant dense<0.000000e+00> : vector<16x8xf32>
    %97 = tpu.matmul %96, %82, %cst_34 {dimension_numbers = #tpu.dot_dimension_numbers<[1], [0], [0], [1], [0, 0, 1, 1], [], []>} : vector<16x16xf32>, vector<16x8xf32>, vector<16x8xf32> -> vector<16x8xf32>
    %c24 = arith.constant 24 : index
    %c96_35 = arith.constant 96 : index
    %98 = vector.load %arg2[%c24, %c96_35] : memref<64x128xf32, #tpu.memory_space<vmem>>, vector<8x32xf32>
    %cst_36 = arith.constant dense<0.000000e+00> : vector<16x32xf32>
    %99 = tpu.matmul %97, %98, %cst_36 {dimension_numbers = #tpu.dot_dimension_numbers<[1], [0], [0], [1], [0, 0, 1, 1], [], []>} : vector<16x8xf32>, vector<8x32xf32>, vector<16x32xf32> -> vector<16x32xf32>
    %100 = arith.addf %79, %99 : vector<16x32xf32>
    %101 = vector.extract_strided_slice %0 {offsets = [0, 0], sizes = [16, 32], strides = [1, 1]} : vector<48x32xf32> to vector<16x32xf32>
    %102 = vector.broadcast %3 : vector<1x32xf32> to vector<16x32xf32>
    %103 = arith.addf %100, %102 : vector<16x32xf32>
    %104 = arith.addf %103, %101 : vector<16x32xf32>
    %cst_37 = arith.constant dense<0.000000e+00> : vector<16xf32>
    %105 = vector.multi_reduction <add>, %104, %cst_37 [1] : vector<16x32xf32> to vector<16xf32>
    %106 = vector.shape_cast %105 : vector<16xf32> to vector<16x1xf32>
    %cst_38 = arith.constant 3.200000e+01 : f32
    %107 = vector.broadcast %cst_38 : f32 to vector<16x1xf32>
    %108 = arith.divf %106, %107 : vector<16x1xf32>
    %109 = vector.broadcast %108 : vector<16x1xf32> to vector<16x32xf32>
    %110 = arith.subf %104, %109 : vector<16x32xf32>
    %111 = arith.mulf %110, %110 : vector<16x32xf32>
    %cst_39 = arith.constant dense<0.000000e+00> : vector<16xf32>
    %112 = vector.multi_reduction <add>, %111, %cst_39 [1] : vector<16x32xf32> to vector<16xf32>
    %113 = vector.shape_cast %112 : vector<16xf32> to vector<16x1xf32>
    %cst_40 = arith.constant 3.200000e+01 : f32
    %114 = vector.broadcast %cst_40 : f32 to vector<16x1xf32>
    %115 = arith.divf %113, %114 : vector<16x1xf32>
    %116 = vector.broadcast %108 : vector<16x1xf32> to vector<16x32xf32>
    %117 = arith.subf %104, %116 : vector<16x32xf32>
    %cst_41 = arith.constant 9.99999974E-6 : f32
    %118 = vector.broadcast %cst_41 : f32 to vector<16x1xf32>
    %119 = arith.addf %115, %118 : vector<16x1xf32>
    %120 = math.rsqrt %119 : vector<16x1xf32>
    %121 = vector.broadcast %120 : vector<16x1xf32> to vector<16x32xf32>
    %122 = arith.mulf %117, %121 : vector<16x32xf32>
    %123 = vector.broadcast %4 : vector<1x32xf32> to vector<16x32xf32>
    %124 = arith.mulf %122, %123 : vector<16x32xf32>
    %125 = vector.broadcast %5 : vector<1x32xf32> to vector<16x32xf32>
    %126 = arith.addf %124, %125 : vector<16x32xf32>
    %cst_42 = arith.constant dense<0.000000e+00> : vector<16x128xf32>
    %127 = tpu.matmul %126, %11, %cst_42 {dimension_numbers = #tpu.dot_dimension_numbers<[1], [0], [0], [1], [0, 0, 1, 1], [], []>} : vector<16x32xf32>, vector<32x128xf32>, vector<16x128xf32> -> vector<16x128xf32>
    %128 = vector.broadcast %8 : vector<1x128xf32> to vector<16x128xf32>
    %129 = arith.addf %127, %128 : vector<16x128xf32>
    %cst_43 = arith.constant 0.000000e+00 : f32
    %130 = vector.broadcast %cst_43 : f32 to vector<16x128xf32>
    %131 = arith.maximumf %129, %130 : vector<16x128xf32>
    %c0_44 = arith.constant 0 : index
    %c0_45 = arith.constant 0 : index
    %132 = vector.load %arg3[%c0_44, %c0_45] : memref<128x32xf32, #tpu.memory_space<vmem>>, vector<128x32xf32>
    %cst_46 = arith.constant dense<0.000000e+00> : vector<16x32xf32>
    %133 = tpu.matmul %131, %132, %cst_46 {dimension_numbers = #tpu.dot_dimension_numbers<[1], [0], [0], [1], [0, 0, 1, 1], [], []>} : vector<16x128xf32>, vector<128x32xf32>, vector<16x32xf32> -> vector<16x32xf32>
    %134 = vector.broadcast %9 : vector<1x32xf32> to vector<16x32xf32>
    %135 = arith.addf %133, %134 : vector<16x32xf32>
    %136 = arith.addf %126, %135 : vector<16x32xf32>
    %cst_47 = arith.constant dense<0.000000e+00> : vector<16xf32>
    %137 = vector.multi_reduction <add>, %136, %cst_47 [1] : vector<16x32xf32> to vector<16xf32>
    %138 = vector.shape_cast %137 : vector<16xf32> to vector<16x1xf32>
    %cst_48 = arith.constant 3.200000e+01 : f32
    %139 = vector.broadcast %cst_48 : f32 to vector<16x1xf32>
    %140 = arith.divf %138, %139 : vector<16x1xf32>
    %141 = vector.broadcast %140 : vector<16x1xf32> to vector<16x32xf32>
    %142 = arith.subf %136, %141 : vector<16x32xf32>
    %143 = arith.mulf %142, %142 : vector<16x32xf32>
    %cst_49 = arith.constant dense<0.000000e+00> : vector<16xf32>
    %144 = vector.multi_reduction <add>, %143, %cst_49 [1] : vector<16x32xf32> to vector<16xf32>
    %145 = vector.shape_cast %144 : vector<16xf32> to vector<16x1xf32>
    %cst_50 = arith.constant 3.200000e+01 : f32
    %146 = vector.broadcast %cst_50 : f32 to vector<16x1xf32>
    %147 = arith.divf %145, %146 : vector<16x1xf32>
    %148 = vector.broadcast %140 : vector<16x1xf32> to vector<16x32xf32>
    %149 = arith.subf %136, %148 : vector<16x32xf32>
    %cst_51 = arith.constant 9.99999974E-6 : f32
    %150 = vector.broadcast %cst_51 : f32 to vector<16x1xf32>
    %151 = arith.addf %147, %150 : vector<16x1xf32>
    %152 = math.rsqrt %151 : vector<16x1xf32>
    %153 = vector.broadcast %152 : vector<16x1xf32> to vector<16x32xf32>
    %154 = arith.mulf %149, %153 : vector<16x32xf32>
    %155 = vector.broadcast %6 : vector<1x32xf32> to vector<16x32xf32>
    %156 = arith.mulf %154, %155 : vector<16x32xf32>
    %157 = vector.broadcast %7 : vector<1x32xf32> to vector<16x32xf32>
    %158 = arith.addf %156, %157 : vector<16x32xf32>
    %c0_52 = arith.constant 0 : index
    %c0_53 = arith.constant 0 : index
    %159 = vector.load %arg5[%c0_52, %c0_53] : memref<16x32xf32, #tpu.memory_space<vmem>>, vector<16x32xf32>
    tpu.vector_store %arg5[%c0_52, %c0_53], %158 {strides = array<i32>} : memref<16x32xf32, #tpu.memory_space<vmem>>, vector<16x32xf32>,
    return
  }
}

</mosaic_0001>

<bundles_post_ra>
// kernel: encoder_block.1
= control target key start
LH: loop header
LB: loop body
LE: loop exit
PB: predicated region body
PF: predicated region fallthrough
CT: control target
= control target key end

     0   :  { %vm40_vm0 = vcmask 261120   ;;  %s2302_s0 = inlined_call_operand.vmem [shape: f32[48,32], index: 0, kind: input, shape index: {}]   ;;  %s2303_s1 = inlined_call_operand.vmem [shape: f32[16,16], index: 1, kind: input, shape index: {}]   ;;  %s2304_s2 = inlined_call_operand.vmem [shape: f32[64,128], index: 2, kind: input, shape index: {}]   ;;  %s2305_s3 = inlined_call_operand.vmem [shape: f32[128,32], index: 3, kind: input, shape index: {}]   ;;  %s2306_s4 = inlined_call_operand.vmem [shape: f32[4,128], index: 4, kind: input, shape index: {}]   ;;  %s2307_s5 = inlined_call_operand.hbm [shape: f32[16,32], index: 5, kind: output, shape index: {}]  }
   0x1   :  { %v1990_v0 = vld [vmem:[%s2304_s2 + $0x18] sm:$0xff]  ;;  %v1995_v1 = vld [vmem:[%s2304_s2 + $0x10] sm:$0xff]  ;;  %v2001_v2 = vld [vmem:[%s2302_s0] sm:$0xff] }
   0x2   :  { %1726 = vmatprep.subr.mxu1 %v1990_v0  ;;  %v2007_v3 = vld [vmem:[%s2304_s2 + $0x8] sm:$0xff]  ;;  %1734 = vmatprep.mubr.msk.f32.mxu1 %vm40_vm0, %v2001_v2 }
   0x3   :  { %1727 = vmatpush3.msra.mxu1 %v1990_v0 }
   0x4   :  { %1728 = vmatprep.subr.mxu1 %v1995_v1 }
   0x5   :  { %10 = vsyncpa [#allocation3], 0  ;;  %1729 = vmatpush3.msra.mxu1 %v1995_v1  ;;  %v2016_v4 = vld [vmem:[%s2304_s2] sm:$0xff]  ;;  %v2023_v5 = vld [vmem:[%s2302_s0 + $0x8] sm:$0xff]  ;;  %v36_v10 = vlaneseq  ;;  %vm162_vm1 = vcmask 64512   ;;  %s1944_s15 = smov 120  }
   0x6   :  { %1730 = vmatprep.subr.mxu1 %v2007_v3  ;;  %v23_v6 = vld [vmem:[%s2302_s0 + $0x10] sm:$0xff]  ;;  %v24_v7 = vld [vmem:[%s2302_s0 + $0x18] sm:$0xff]  ;;  %v25_v8 = vld [vmem:[%s2302_s0 + $0x20] sm:$0xff]  ;;  %vm252_vm2 = vcmask 130048   ;;  %s1946_s20 = smov 56   ;;  %s1947_s21 = smov 80  }
   0x7   :  { %1731 = vmatpush3.msra.mxu1 %v2007_v3  ;;  %v26_v9 = vld [vmem:[%s2302_s0 + $0x28] sm:$0xff]  ;;  %v2045_v11 = vshrl.u32 %v36_v10, 7  ;;  %v2051_v13 = vld [vmem:[%s2306_s4] sm:$0xf]  ;;  %s1942_s0 = smov 88   ;;  %s1943_s4 = smov 96  }
   0x8   :  { %1732 = vmatprep.subr.mxu1 %v2016_v4  ;;  %v2093_v32 = vld [vmem:[%s2303_s1 + $0x8] sm:$0xff]  ;;  %v2098_v36 = vld [vmem:[%s2303_s1] sm:$0xff]  ;;  %s1945_s1 = smov 64   ;;  %s1948_s22 = smov 112  }
   0x9   :  { %1733 = vmatpush3.msra.mxu1 %v2016_v4  ;;  %v38_v12 = vsub.s32 0, %v2045_v11  ;;  %s1949_s23 = smov 72   ;;  %s1950_s24 = smov 32  }
   0xa   :  { %1735 = vmatmul.mubr.msk.f32.vlgmr.msra.gmra.mxu1 %vm40_vm0, %v2023_v5  ;;  %s1951_s25 = smov 104   ;;  %s1952_s26 = smov 48  }
   0xb   :  { %1737 = vmatprep.mubr.msk.f32.mxu1 %vm40_vm0, %v23_v6  ;;  %v2054_v15 = vrot.slane %v2051_v13, %v38_v12  ;;  %s1953_s27 = smov 40  }
   0xe   :  { %1738 = vmatmul.mubr.msk.f32.gmra.mxu1 %vm40_vm0, %v24_v7 }
   0xf   :  { %1740 = vmatprep.mubr.msk.f32.mxu1 %vm40_vm0, %v25_v8 }
  0x12   :  { %1741 = vmatmul.mubr.msk.f32.gmra.mxu1 %vm40_vm0, %v26_v9 }
  0xca   :  { %v1736_v14 = vpop.f32.mrf.mxu1 }
  0xcb   :  { %v2074_v22 = vadd.f32 %v1736_v14, %v2054_v15 }
  0xcc   :  { %v125_v16 = vpop.f32.mrf.mxu1 }
  0xcd   :  { %v2057_v17 = vadd.f32 %v125_v16, %v2054_v15 }
  0xce   :  { %v1739_v18 = vpop.f32.mrf.mxu1 }
  0xcf   :  { %v2060_v19 = vadd.f32 %v1739_v18, %v2054_v15  ;;  %1747 = vmatprep.mubr.msk.f32.mxu1 %vm162_vm1, %v2057_v17 }
  0xd0   :  { %v135_v20 = vpop.f32.mrf.mxu1 }
  0xd1   :  { %371 = vrot.lane.b32.xlu1 %v2060_v19, %s1942_s0  ;;  %160 = vrot.lane.b32.xlu0 %v2060_v19, %s1943_s4  ;;  %v2068_v21 = vadd.f32 %v135_v20, %v2054_v15 }
  0xd2   :  { %v1742_v29 = vpop.f32.mrf.mxu1 }
  0xd3   :  { %v2109_v49 = vadd.f32 %v1742_v29, %v2054_v15 }
  0xd4   :  { %v145_v30 = vpop.f32.mrf.mxu1 }
  0xd5   :  { %369 = vrot.lane.b32.xlu1 %v2068_v21, %s1942_s0  ;;  %158 = vrot.lane.b32.xlu0 %v2068_v21, %s1943_s4  ;;  %v2120_v16 = vadd.f32 %v145_v30, %v2054_v15 }
  0xd9   :  { %367 = vrot.lane.b32.xlu1 %v2074_v22, %s1944_s15  ;;  %365 = vrot.lane.b32.xlu0 %v2057_v17, %s1944_s15 }
 0x143   :  { %v372_v23 = vpop.permute.xlu1 %371  ;;  %v161_v24 = vpop.permute.xlu0 %160 }
 0x144   :  { %1743 = vmatprep.subr.msk.mxu1 %vm162_vm1, %v161_v24  ;;  %1757 = vmatprep.subr.msk.mxu0 %vm162_vm1, %v372_v23 }
 0x145   :  { %1744 = vmatpush3.xpose.msk.msra.mxu1 %vm162_vm1, %v161_v24  ;;  %1758 = vmatpush3.xpose.msk.msra.mxu0 %vm162_vm1, %v372_v23 }
 0x147   :  { %v370_v25 = vpop.permute.xlu1 %369  ;;  %v159_v26 = vpop.permute.xlu0 %158 }
 0x148   :  { %1745 = vmatprep.subr.msk.mxu1 %vm162_vm1, %v159_v26  ;;  %1759 = vmatprep.subr.msk.mxu0 %vm162_vm1, %v370_v25 }
 0x149   :  { %1746 = vmatpush3.xpose.msk.msra.mxu1 %vm162_vm1, %v159_v26  ;;  %1760 = vmatpush3.xpose.msk.msra.mxu0 %vm162_vm1, %v370_v25 }
 0x14b   :  { %v368_v27 = vpop.permute.xlu1 %367  ;;  %v366_v28 = vpop.permute.xlu0 %365 }
 0x14c   :  { %1748 = vmatmul.mubr.msk.f32.vlgmr.msra.gmra.mxu1 %vm162_vm1, %v2074_v22  ;;  %1761 = vmatprep.mubr.msk.f32.mxu0 %vm162_vm1, %v366_v28 }
 0x14d   :  { %1762 = vmatmul.mubr.msk.f32.vlgmr.msra.gmra.mxu0 %vm162_vm1, %v368_v27 }
 0x20c   :  { %v1749_v31 = vpop.f32.mrf.mxu1 }
 0x20d   :  { %v249_v33 = vmul.f32 0.35355338, %v1749_v31  ;;  %v1763_v34 = vpop.f32.mrf.mxu0 }
 0x20e   :  { %v239_v35 = vpop.f32.mrf.mxu1  ;;  %v457_v43 = vmul.f32 0.35355338, %v1763_v34 }
 0x20f   :  { %v248_v37 = vmul.f32 0.35355338, %v239_v35  ;;  %v447_v38 = vpop.f32.mrf.mxu0  ;;  %v251_v39 = vadd.f32 %v249_v33, %v2093_v32 }
 0x210   :  { %v456_v40 = vmul.f32 0.35355338, %v447_v38  ;;  %v459_v47 = vadd.f32 %v457_v43, %v2093_v32 }
 0x211   :  { %v256_v41 = vsel %vm252_vm2, %v251_v39, -inf  ;;  %v250_v42 = vadd.f32 %v248_v37, %v2098_v36 }
 0x212   :  { %257 = vmax.xlane.f32.xlu1 %v256_v41  ;;  %v458_v45 = vadd.f32 %v456_v40, %v2098_v36  ;;  %v463_v48 = vsel %vm252_vm2, %v459_v47, -inf }
 0x213   :  { %v253_v44 = vsel %vm252_vm2, %v250_v42, -inf }
 0x214   :  { %254 = vmax.xlane.f32.xlu0 %v253_v44  ;;  %v460_v46 = vsel %vm252_vm2, %v458_v45, -inf }
 0x218   :  { %461 = vmax.xlane.f32.xlu0 %v460_v46 }
 0x21c   :  { %464 = vmax.xlane.f32.xlu0 %v463_v48 }
 0x223   :  { %279 = vrot.lane.b32.xlu1 %v2109_v49, %s1945_s1 }
 0x227   :  { %484 = vrot.lane.b32.xlu1 %v2109_v49, %s1946_s20 }
 0x29b   :  { %v258_v50 = vpop.xlane.xlu1 %257 }
 0x29c   :  { %v260_v51 = vsub.f32 %v251_v39, %v258_v50 }
 0x29d   :  { %v255_v52 = vpop.xlane.xlu0 %254 }
 0x29e   :  { %v263_v53 = vmul.f32 1.442695, %v260_v51  ;;  %v259_v54 = vsub.f32 %v250_v42, %v255_v52 }
 0x29f   :  { %v280_v55 = vpop.permute.xlu1 %279 }
 0x2a0   :  { %1880 = vpow2.f32 %v263_v53  ;;  %v261_v56 = vmul.f32 1.442695, %v259_v54  ;;  %1750 = vmatprep.subr.mxu1 %v280_v55 }
 0x2a1   :  { %1751 = vmatpush3.msra.mxu1 %v280_v55  ;;  %v462_v57 = vpop.xlane.xlu0 %461 }
 0x2a2   :  { %1882 = vpow2.f32 %v261_v56  ;;  %v466_v58 = vsub.f32 %v458_v45, %v462_v57 }
 0x2a3   :  { %v485_v18 = vpop.permute.xlu1 %484 }
 0x2a4   :  { %v468_v59 = vmul.f32 1.442695, %v466_v58 }
 0x2a5   :  { %v465_v60 = vpop.xlane.xlu0 %464 }
 0x2a6   :  { %1884 = vpow2.f32 %v468_v59  ;;  %v467_v61 = vsub.f32 %v459_v47, %v465_v60 }
 0x2a8   :  { %v470_v62 = vmul.f32 1.442695, %v467_v61 }
 0x2aa   :  { %1886 = vpow2.f32 %v470_v62 }
 0x2ad   :  { %v1881_v63 = vpop.eup %1880 }
 0x2ae   :  { %v268_v6 = vsel %vm252_vm2, %v1881_v63, 0.0 }
 0x2af   :  { %v1883_v7 = vpop.eup %1882  ;;  %269 = vadd.xlane.f32.xlu0 %v268_v6 }
 0x2b0   :  { %v265_v8 = vsel %vm252_vm2, %v1883_v7, 0.0 }
 0x2b1   :  { %266 = vadd.xlane.f32.xlu1 %v265_v8 }
 0x2b3   :  { %v1885_v9 = vpop.eup %1884 }
 0x2b4   :  { %v472_v10 = vsel %vm252_vm2, %v1885_v9, 0.0 }
 0x2b5   :  { %473 = vadd.xlane.f32.xlu1 %v472_v10 }
 0x2b7   :  { %v1887_v12 = vpop.eup %1886 }
 0x2b8   :  { %v475_v14 = vsel %vm252_vm2, %v1887_v12, 0.0 }
 0x2b9   :  { %476 = vadd.xlane.f32.xlu0 %v475_v14 }
 0x2c6   :  { %482 = vrot.lane.b32.xlu1 %v2120_v16, %s1946_s20 }
 0x2ca   :  { %746 = vrot.lane.b32.xlu1 %v2060_v19, %s1947_s21 }
 0x2ce   :  { %740 = vrot.lane.b32.xlu1 %v2057_v17, %s1948_s22 }
 0x2cf   :  { %277 = vrot.lane.b32.xlu0 %v2120_v16, %s1945_s1 }
 0x2d2   :  { %1038 = vrot.lane.b32.xlu1 %v2060_v19, %s1949_s23 }
 0x2d3   :  { %571 = vrot.lane.b32.xlu0 %v2007_v3, %s1950_s24 }
 0x2d6   :  { %1032 = vrot.lane.b32.xlu1 %v2057_v17, %s1951_s25 }
 0x2d7   :  { %744 = vrot.lane.b32.xlu0 %v2068_v21, %s1947_s21 }
 0x2db   :  { %742 = vrot.lane.b32.xlu0 %v2074_v22, %s1948_s22 }
 0x2df   :  { %1036 = vrot.lane.b32.xlu0 %v2068_v21, %s1949_s23 }
 0x2e3   :  { %1034 = vrot.lane.b32.xlu0 %v2074_v22, %s1951_s25 }
 0x338   :  { %v270_v20 = vpop.xlane.xlu0 %269 }
 0x339   :  { %1888 = vrcp.f32 %v270_v20 }
 0x33a   :  { %v267_v23 = vpop.xlane.xlu1 %266 }
 0x33b   :  { %1890 = vrcp.f32 %v267_v23 }
 0x33e   :  { %v474_v19 = vpop.xlane.xlu1 %473 }
 0x33f   :  { %1892 = vrcp.f32 %v474_v19 }
 0x342   :  { %v477_v24 = vpop.xlane.xlu0 %476  ;;  %v483_v22 = vpop.permute.xlu1 %482 }
 0x343   :  { %1894 = vrcp.f32 %v477_v24 }
 0x346   :  { %v278_v3 = vpop.permute.xlu0 %277  ;;  %v1889_v25 = vpop.eup %1888 }
 0x347   :  { %1752 = vmatprep.subr.mxu1 %v278_v3  ;;  %v274_v27 = vmul.f32 %v1889_v25, %v1881_v63  ;;  %v747_v33 = vpop.permute.xlu1 %746 }
 0x348   :  { %v1891_v17 = vpop.eup %1890  ;;  %1753 = vmatpush3.msra.mxu1 %v278_v3 }
 0x349   :  { %1764 = vmatprep.subr.mxu1 %v485_v18  ;;  %v273_v26 = vmul.f32 %v1891_v17, %v1883_v7 }
 0x34a   :  { %v572_v29 = vpop.permute.xlu0 %571 }
 0x34b   :  { %1754 = vmatprep.mubr.msk.f32.mxu1 %vm252_vm2, %v273_v26  ;;  %v741_v37 = vpop.permute.xlu1 %740 }
 0x34c   :  { %v1893_v21 = vpop.eup %1892  ;;  %1755 = vmatmul.mubr.msk.f32.vlgmr.msra.gmra.mxu1 %vm252_vm2, %v274_v27 }
 0x34d   :  { %1765 = vmatpush3.msra.mxu1 %v485_v18  ;;  %v480_v28 = vmul.f32 %v1893_v21, %v1885_v9 }
 0x34e   :  { %1766 = vmatprep.subr.mxu1 %v483_v22  ;;  %v745_v39 = vpop.permute.xlu0 %744 }
 0x34f   :  { %1767 = vmatpush3.msra.mxu1 %v483_v22  ;;  %1768 = vmatprep.mubr.msk.f32.mxu1 %vm252_vm2, %v480_v28  ;;  %v1039_v41 = vpop.permute.xlu1 %1038 }
 0x350   :  { %v1895_v30 = vpop.eup %1894  ;;  %1771 = vmatprep.subr.mxu1 %v572_v29 }
 0x351   :  { %v481_v31 = vmul.f32 %v1895_v30, %v1887_v12 }
 0x352   :  { %v743_v42 = vpop.permute.xlu0 %742 }
 0x353   :  { %1769 = vmatmul.mubr.msk.f32.vlgmr.msra.gmra.mxu1 %vm252_vm2, %v481_v31  ;;  %v1033_v43 = vpop.permute.xlu1 %1032 }
 0x354   :  { %1772 = vmatpush3.msra.mxu1 %v572_v29 }
 0x355   :  { %1781 = vmatprep.subr.msk.mxu1 %vm162_vm1, %v747_v33 }
 0x356   :  { %v1037_v44 = vpop.permute.xlu0 %1036 }
 0x35a   :  { %v1035_v45 = vpop.permute.xlu0 %1034 }
 0x40c   :  { %v2141_v34 = vpop.f32.mrf.mxu1 }
 0x40e   :  { %v355_v35 = vpop.f32.mrf.mxu1 }
 0x40f   :  { %1778 = vmatprep.mubr.msk.f32.mxu0 %vm162_vm1, %v355_v35 }
 0x413   :  { %v1770_v38 = vpop.f32.mrf.mxu1 }
 0x415   :  { %v560_v40 = vpop.f32.mrf.mxu1 }
 0x416   :  { %1773 = vmatprep.mubr.msk.f32.mxu1 %vm162_vm1, %v560_v40 }
 0x417   :  { %1774 = vmatmul.mubr.msk.f32.vlgmr.msra.gmra.mxu1 %vm162_vm1, %v1770_v38 }
 0x418   :  { %1782 = vmatpush3.xpose.msk.msra.mxu1 %vm162_vm1, %v747_v33  ;;  %1785 = vmatprep.mubr.msk.f32.mxu1 %vm162_vm1, %v741_v37 }
 0x419   :  { %1783 = vmatprep.subr.msk.mxu1 %vm162_vm1, %v745_v39 }
 0x41c   :  { %1784 = vmatpush3.xpose.msk.msra.mxu1 %vm162_vm1, %v745_v39 }
 0x41d   :  { %1800 = vmatprep.subr.msk.mxu1 %vm162_vm1, %v1039_v41 }
 0x41f   :  { %1786 = vmatmul.mubr.msk.f32.vlgmr.msra.gmra.mxu1 %vm162_vm1, %v743_v42 }
 0x420   :  { %1801 = vmatpush3.xpose.msk.msra.mxu1 %vm162_vm1, %v1039_v41  ;;  %1804 = vmatprep.mubr.msk.f32.mxu1 %vm162_vm1, %v1033_v43 }
 0x421   :  { %1802 = vmatprep.subr.msk.mxu1 %vm162_vm1, %v1037_v44 }
 0x424   :  { %1803 = vmatpush3.xpose.msk.msra.mxu1 %vm162_vm1, %v1037_v44 }
 0x427   :  { %1805 = vmatmul.mubr.msk.f32.vlgmr.msra.gmra.mxu1 %vm162_vm1, %v1035_v45 }
 0x4d7   :  { %v2157_v46 = vpop.f32.mrf.mxu1 }
 0x4d9   :  { %v2159_v47 = vpop.f32.mrf.mxu1 }
 0x4df   :  { %v1787_v48 = vpop.f32.mrf.mxu1 }
 0x4e0   :  { %v832_v50 = vmul.f32 0.35355338, %v1787_v48 }
 0x4e1   :  { %v822_v51 = vpop.f32.mrf.mxu1 }
 0x4e2   :  { %v831_v52 = vmul.f32 0.35355338, %v822_v51  ;;  %v834_v53 = vadd.f32 %v832_v50, %v2093_v32 }
 0x4e4   :  { %v838_v54 = vsel %vm252_vm2, %v834_v53, -inf  ;;  %v833_v55 = vadd.f32 %v831_v52, %v2098_v36 }
 0x4e5   :  { %839 = vmax.xlane.f32.xlu0 %v838_v54 }
 0x4e6   :  { %v835_v56 = vsel %vm252_vm2, %v833_v55, -inf }
 0x4e7   :  { %836 = vmax.xlane.f32.xlu1 %v835_v56  ;;  %v1806_v9 = vpop.f32.mrf.mxu1 }
 0x4e8   :  { %v1124_v14 = vmul.f32 0.35355338, %v1806_v9 }
 0x4e9   :  { %v1114_v10 = vpop.f32.mrf.mxu1 }
 0x4ea   :  { %v1123_v12 = vmul.f32 0.35355338, %v1114_v10  ;;  %v1126_v20 = vadd.f32 %v1124_v14, %v2093_v32 }
 0x4ec   :  { %v1125_v18 = vadd.f32 %v1123_v12, %v2098_v36  ;;  %v1130_v19 = vsel %vm252_vm2, %v1126_v20, -inf }
 0x4ee   :  { %v1127_v23 = vsel %vm252_vm2, %v1125_v18, -inf }
 0x56e   :  { %v840_v57 = vpop.xlane.xlu0 %839 }
 0x56f   :  { %v842_v58 = vsub.f32 %v834_v53, %v840_v57 }
 0x570   :  { %v837_v59 = vpop.xlane.xlu1 %836 }
 0x571   :  { %v845_v60 = vmul.f32 1.442695, %v842_v58  ;;  %v841_v61 = vsub.f32 %v833_v55, %v837_v59 }
 0x573   :  { %1896 = vpow2.f32 %v845_v60  ;;  %v843_v62 = vmul.f32 1.442695, %v841_v61 }
 0x575   :  { %1898 = vpow2.f32 %v843_v62 }
 0x580   :  { %v1897_v63 = vpop.eup %1896 }
 0x581   :  { %v850_v6 = vsel %vm252_vm2, %v1897_v63, 0.0 }
 0x582   :  { %v1899_v7 = vpop.eup %1898  ;;  %851 = vadd.xlane.f32.xlu1 %v850_v6 }
 0x583   :  { %v847_v8 = vsel %vm252_vm2, %v1899_v7, 0.0 }
 0x584   :  { %848 = vadd.xlane.f32.xlu0 %v847_v8 }
 0x593   :  { %859 = vrot.lane.b32.xlu1 %v2109_v49, %s1952_s26 }
 0x597   :  { %857 = vrot.lane.b32.xlu1 %v2120_v16, %s1952_s26 }
 0x59a   :  { %656 = vrot.lane.b32.xlu0 %v2016_v4, %s1950_s24 }
 0x5b9   :  { %1128 = vmax.xlane.f32.xlu0 %v1127_v23 }
 0x5bb   :  { %1131 = vmax.xlane.f32.xlu1 %v1130_v19 }
 0x5cc   :  { %946 = vrot.lane.b32.xlu1 %v1995_v1, %s1950_s24 }
 0x5d0   :  { %1149 = vrot.lane.b32.xlu1 %v2120_v16, %s1953_s27 }
 0x5d4   :  { %1237 = vrot.lane.b32.xlu1 %v1990_v0, %s1950_s24 }
 0x60b   :  { %v852_v4 = vpop.xlane.xlu1 %851 }
 0x60c   :  { %1900 = vrcp.f32 %v852_v4  ;;  %v1360_v4 = vsub.s32 1, %v2045_v11 }
 0x60d   :  { %v849_v36 = vpop.xlane.xlu0 %848 }
 0x60e   :  { %1902 = vrcp.f32 %v849_v36  ;;  %v35_v36 = vld [vmem:[%s2304_s2 + $0x38] sm:$0xff] }
 0x60f   :  { %v860_v32 = vpop.permute.xlu1 %859  ;;  %1819 = vmatprep.subr.mxu1 %v35_v36 }
 0x610   :  { %1820 = vmatpush3.msra.mxu1 %v35_v36 }
 0x611   :  { %v657_v24 = vpop.permute.xlu0 %656 }
 0x612   :  { %1776 = vmatprep.subr.mxu0 %v657_v24 }
 0x613   :  { %1777 = vmatpush3.msra.mxu0 %v657_v24  ;;  %v858_v1 = vpop.permute.xlu1 %857  ;;  %v2221_v24 = vrot.slane %v2051_v13, %v1360_v4 }
 0x614   :  { %1779 = vmatmul.mubr.msk.f32.vlgmr.msra.gmra.mxu0 %vm162_vm1, %v2141_v34  ;;  %1788 = vmatprep.subr.mxu0 %v860_v32 }
 0x615   :  { %1789 = vmatpush3.msra.mxu0 %v860_v32  ;;  %v34_v32 = vld [vmem:[%s2304_s2 + $0x30] sm:$0xff] }
 0x616   :  { %1790 = vmatprep.subr.mxu0 %v858_v1  ;;  %1821 = vmatprep.subr.mxu1 %v34_v32 }
 0x617   :  { %1791 = vmatpush3.msra.mxu0 %v858_v1  ;;  %1822 = vmatpush3.msra.mxu1 %v34_v32  ;;  %v33_v1 = vld [vmem:[%s2304_s2 + $0x28] sm:$0xff] }
 0x618   :  { %1823 = vmatprep.subr.mxu1 %v33_v1 }
 0x619   :  { %v1901_v16 = vpop.eup %1900  ;;  %1824 = vmatpush3.msra.mxu1 %v33_v1 }
 0x61a   :  { %v856_v0 = vmul.f32 %v1901_v16, %v1897_v63  ;;  %v32_v16 = vld [vmem:[%s2304_s2 + $0x20] sm:$0xff] }
 0x61b   :  { %v1903_v3 = vpop.eup %1902  ;;  %1825 = vmatprep.subr.mxu1 %v32_v16 }
 0x61c   :  { %v855_v25 = vmul.f32 %v1903_v3, %v1899_v7  ;;  %1826 = vmatpush3.msra.mxu1 %v32_v16  ;;  %v1472_v3 = vld [vmem:[%s2305_s3 + $0x78] sm:$0xff] }
 0x61e   :  { %1792 = vmatprep.mubr.msk.f32.mxu0 %vm252_vm2, %v855_v25  ;;  %v1471_v25 = vld [vmem:[%s2305_s3 + $0x70] sm:$0xff] }
 0x61f   :  { %1793 = vmatmul.mubr.msk.f32.vlgmr.msra.gmra.mxu0 %vm252_vm2, %v856_v0  ;;  %v1470_v0 = vld [vmem:[%s2305_s3 + $0x68] sm:$0xff] }
 0x642   :  { %v1129_v17 = vpop.xlane.xlu0 %1128 }
 0x643   :  { %v1133_v26 = vsub.f32 %v1125_v18, %v1129_v17  ;;  %v1469_v17 = vld [vmem:[%s2305_s3 + $0x60] sm:$0xff] }
 0x644   :  { %v1132_v27 = vpop.xlane.xlu1 %1131 }
 0x645   :  { %v1134_v21 = vsub.f32 %v1126_v20, %v1132_v27  ;;  %v1135_v22 = vmul.f32 1.442695, %v1133_v26  ;;  %v1468_v26 = vld [vmem:[%s2305_s3 + $0x58] sm:$0xff]  ;;  %v1467_v27 = vld [vmem:[%s2305_s3 + $0x50] sm:$0xff] }
 0x647   :  { %v1137_v28 = vmul.f32 1.442695, %v1134_v21  ;;  %v1466_v21 = vld [vmem:[%s2305_s3 + $0x48] sm:$0xff] }
 0x648   :  { %v947_v29 = vpop.permute.xlu1 %946 }
 0x649   :  { %1904 = vpow2.f32 %v1137_v28  ;;  %1795 = vmatprep.subr.mxu0 %v947_v29  ;;  %v1464_v28 = vld [vmem:[%s2305_s3 + $0x38] sm:$0xff] }
 0x64a   :  { %1796 = vmatpush3.msra.mxu0 %v947_v29  ;;  %1906 = vpow2.f32 %v1135_v22  ;;  %v1465_v22 = vld [vmem:[%s2305_s3 + $0x40] sm:$0xff]  ;;  %v1463_v29 = vld [vmem:[%s2305_s3 + $0x30] sm:$0xff] }
 0x64c   :  { %v1150_v43 = vpop.permute.xlu1 %1149 }
 0x650   :  { %v1238_v48 = vpop.permute.xlu1 %1237 }
 0x656   :  { %v1905_v30 = vpop.eup %1904 }
 0x657   :  { %v1142_v31 = vsel %vm252_vm2, %v1905_v30, 0.0  ;;  %v1907_v33 = vpop.eup %1906 }
 0x658   :  { %1143 = vadd.xlane.f32.xlu0 %v1142_v31  ;;  %v1139_v34 = vsel %vm252_vm2, %v1907_v33, 0.0  ;;  %v1461_v31 = vld [vmem:[%s2305_s3 + $0x20] sm:$0xff] }
 0x65c   :  { %1140 = vadd.xlane.f32.xlu0 %v1139_v34 }
 0x672   :  { %1151 = vrot.lane.b32.xlu0 %v2109_v49, %s1953_s27 }
 0x676   :  { %1324 = vrot.lane.b32.xlu0 %v2054_v15, %s1950_s24 }
 0x6d4   :  { %v1780_v35 = vpop.f32.mrf.mxu0 }
 0x6d5   :  { %v737_v50 = vadd.f32 %v1780_v35, %v2157_v46 }
 0x6d6   :  { %v731_v37 = vpop.f32.mrf.mxu0 }
 0x6d7   :  { %v732_v52 = vadd.f32 %v731_v37, %v2159_v47 }
 0x6df   :  { %v1794_v38 = vpop.f32.mrf.mxu0 }
 0x6e1   :  { %v935_v39 = vpop.f32.mrf.mxu0  ;;  %v1144_v40 = vpop.xlane.xlu0 %1143 }
 0x6e2   :  { %1797 = vmatprep.mubr.msk.f32.mxu0 %vm162_vm1, %v935_v39  ;;  %1908 = vrcp.f32 %v1144_v40 }
 0x6e3   :  { %1798 = vmatmul.mubr.msk.f32.vlgmr.msra.gmra.mxu0 %vm162_vm1, %v1794_v38 }
 0x6e5   :  { %v1141_v41 = vpop.xlane.xlu0 %1140 }
 0x6e6   :  { %1910 = vrcp.f32 %v1141_v41 }
 0x6e9   :  { %v1152_v42 = vpop.permute.xlu0 %1151 }
 0x6ea   :  { %1807 = vmatprep.subr.mxu0 %v1152_v42 }
 0x6eb   :  { %1808 = vmatpush3.msra.mxu0 %v1152_v42 }
 0x6ec   :  { %1809 = vmatprep.subr.mxu0 %v1150_v43 }
 0x6ed   :  { %1810 = vmatpush3.msra.mxu0 %v1150_v43  ;;  %v1325_v59 = vpop.permute.xlu0 %1324 }
 0x6ee   :  { %1814 = vmatprep.subr.mxu0 %v1238_v48 }
 0x6ef   :  { %v1909_v49 = vpop.eup %1908 }
 0x6f0   :  { %v1148_v45 = vmul.f32 %v1909_v49, %v1905_v30  ;;  %v1462_v30 = vld [vmem:[%s2305_s3 + $0x28] sm:$0xff] }
 0x6f3   :  { %v1911_v15 = vpop.eup %1910 }
 0x6f4   :  { %v1147_v44 = vmul.f32 %v1911_v15, %v1907_v33 }
 0x6f6   :  { %1811 = vmatprep.mubr.msk.f32.mxu0 %vm252_vm2, %v1147_v44 }
 0x6f7   :  { %1812 = vmatmul.mubr.msk.f32.vlgmr.msra.gmra.mxu0 %vm252_vm2, %v1148_v45 }
 0x6f8   :  { %1815 = vmatpush3.msra.mxu0 %v1238_v48 }
 0x6f9   :  { %1830 = vmatprep.subr.mxu0 %v1472_v3 }
 0x7a3   :  { %v1799_v51 = vpop.f32.mrf.mxu0 }
 0x7a4   :  { %v1031_v53 = vadd.f32 %v1799_v51, %v737_v50  ;;  %v1460_v50 = vld [vmem:[%s2305_s3 + $0x18] sm:$0xff]  ;;  %v1459_v51 = vld [vmem:[%s2305_s3 + $0x10] sm:$0xff] }
 0x7a5   :  { %v1021_v54 = vpop.f32.mrf.mxu0 }
 0x7a6   :  { %v1030_v55 = vadd.f32 %v1021_v54, %v732_v52  ;;  %v1458_v52 = vld [vmem:[%s2305_s3 + $0x8] sm:$0xff]  ;;  %v1372_v54 = vsub.s32 2, %v2045_v11 }
 0x7b7   :  { %v1813_v56 = vpop.f32.mrf.mxu0 }
 0x7b9   :  { %v1227_v57 = vpop.f32.mrf.mxu0 }
 0x7ba   :  { %1816 = vmatprep.mubr.msk.f32.mxu0 %vm162_vm1, %v1227_v57 }
 0x7bb   :  { %1817 = vmatmul.mubr.msk.f32.vlgmr.msra.gmra.mxu0 %vm162_vm1, %v1813_v56 }
 0x7bc   :  { %1831 = vmatpush3.msra.mxu0 %v1472_v3 }
 0x7bd   :  { %1832 = vmatprep.subr.mxu0 %v1471_v25 }
 0x7be   :  { %1833 = vmatpush3.msra.mxu0 %v1471_v25 }
 0x7bf   :  { %1834 = vmatprep.subr.mxu0 %v1470_v0 }
 0x7c0   :  { %1835 = vmatpush3.msra.mxu0 %v1470_v0 }
 0x7c1   :  { %1836 = vmatprep.subr.mxu0 %v1469_v17 }
 0x7c2   :  { %1837 = vmatpush3.msra.mxu0 %v1469_v17 }
 0x7c3   :  { %1838 = vmatprep.subr.mxu0 %v1468_v26 }
 0x7c4   :  { %1839 = vmatpush3.msra.mxu0 %v1468_v26 }
 0x7c5   :  { %1840 = vmatprep.subr.mxu0 %v1467_v27 }
 0x7c6   :  { %1841 = vmatpush3.msra.mxu0 %v1467_v27 }
 0x7c7   :  { %1842 = vmatprep.subr.mxu0 %v1466_v21 }
 0x7c8   :  { %1843 = vmatpush3.msra.mxu0 %v1466_v21 }
 0x7c9   :  { %1844 = vmatprep.subr.mxu0 %v1465_v22 }
 0x7ca   :  { %1845 = vmatpush3.msra.mxu0 %v1465_v22 }
 0x7cb   :  { %1846 = vmatprep.subr.mxu0 %v1464_v28 }
 0x7cc   :  { %1847 = vmatpush3.msra.mxu0 %v1464_v28 }
 0x7cd   :  { %1848 = vmatprep.subr.mxu0 %v1463_v29 }
 0x7ce   :  { %1849 = vmatpush3.msra.mxu0 %v1463_v29 }
 0x7cf   :  { %1850 = vmatprep.subr.mxu0 %v1462_v30 }
 0x7d0   :  { %1851 = vmatpush3.msra.mxu0 %v1462_v30 }
 0x7d1   :  { %1852 = vmatprep.subr.mxu0 %v1461_v31 }
 0x7d2   :  { %1853 = vmatpush3.msra.mxu0 %v1461_v31 }
 0x7d3   :  { %1854 = vmatprep.subr.mxu0 %v1460_v50 }
 0x7d4   :  { %1855 = vmatpush3.msra.mxu0 %v1460_v50 }
 0x7d5   :  { %1856 = vmatprep.subr.mxu0 %v1459_v51 }
 0x7d6   :  { %1857 = vmatpush3.msra.mxu0 %v1459_v51 }
 0x7d7   :  { %1858 = vmatprep.subr.mxu0 %v1458_v52 }
 0x7d8   :  { %1859 = vmatpush3.msra.mxu0 %v1458_v52 }
 0x87b   :  { %v1818_v58 = vpop.f32.mrf.mxu0 }
 0x87c   :  { %v1322_v60 = vadd.f32 %v1818_v58, %v1031_v53  ;;  %v1457_v53 = vld [vmem:[%s2305_s3] sm:$0xff]  ;;  %s1954_s3 = smov [#allocation2]  }
 0x87d   :  { %v1312_v61 = vpop.f32.mrf.mxu0  ;;  %1860 = vmatprep.subr.mxu0 %v1457_v53  ;;  %s1597_s0 = sshll.u32 %s1954_s3, 4  ;;  %s1598_s0 = int_to_ptr.vmem [resolvable:$true] %s1597_s0 }
 0x87e   :  { %v1321_v62 = vadd.f32 %v1312_v61, %v1030_v55  ;;  %v1328_v63 = vadd.f32 %v1325_v59, %v1322_v60  ;;  %1861 = vmatpush3.msra.mxu0 %v1457_v53  ;;  %v1373_v55 = vrot.slane %v2051_v13, %v1372_v54  ;;  %p1925_p1 = scmp.lt.s32.totalorder %s1598_s0, %s1598_s0 }
 0x880   :  { %v1327_v6 = vadd.f32 %v1325_v59, %v1321_v62  ;;  %v1330_v46 = vadd.f32 %v1328_v63, %v2023_v5  ;;  %v1475_v62 = vsub.s32 3, %v2045_v11 }
 0x882   :  { %v1334_v47 = vsel %vm40_vm0, %v1330_v46, 0.0  ;;  %v1329_v7 = vadd.f32 %v1327_v6, %v2001_v2  ;;  %v1476_v63 = vrot.slane %v2051_v13, %v1475_v62 }
 0x883   :  { %1335 = vadd.xlane.f32.xlu0 %v1334_v47 }
 0x884   :  { %v1331_v8 = vsel %vm40_vm0, %v1329_v7, 0.0 }
 0x885   :  { %1332 = vadd.xlane.f32.xlu1 %v1331_v8 }
 0x90c   :  { %v1336_v9 = vpop.xlane.xlu0 %1335 }
 0x90d   :  { %v1339_v10 = vmul.f32 0.03125, %v1336_v9 }
 0x90e   :  { %v1333_v12 = vpop.xlane.xlu1 %1332 }
 0x90f   :  { %v2203_v14 = vsub.f32 %v1330_v46, %v1339_v10  ;;  %v1338_v18 = vmul.f32 0.03125, %v1333_v12 }
 0x911   :  { %v2205_v20 = vsub.f32 %v1329_v7, %v1338_v18  ;;  %v1343_v23 = vmul.f32 %v2203_v14, %v2203_v14 }
 0x913   :  { %v1347_v5 = vsel %vm40_vm0, %v1343_v23, 0.0  ;;  %v1342_v2 = vmul.f32 %v2205_v20, %v2205_v20 }
 0x914   :  { %1348 = vadd.xlane.f32.xlu1 %v1347_v5 }
 0x915   :  { %v1344_v19 = vsel %vm40_vm0, %v1342_v2, 0.0 }
 0x916   :  { %1345 = vadd.xlane.f32.xlu0 %v1344_v19 }
 0x92c   :  { %1365 = vrot.lane.b32.xlu0 %v2221_v24, %s1943_s4 }
 0x930   :  { %1585 = vrot.lane.b32.xlu0 %v2221_v24, %s1950_s24 }
 0x99d   :  { %v1349_v33 = vpop.xlane.xlu1 %1348 }
 0x99e   :  { %v1351_v34 = vmul.f32 0.03125, %v1349_v33 }
 0x99f   :  { %v1346_v35 = vpop.xlane.xlu0 %1345 }
 0x9a0   :  { %v1353_v37 = vadd.f32 1e-05, %v1351_v34  ;;  %v1350_v38 = vmul.f32 0.03125, %v1346_v35 }
 0x9a2   :  { %1912 = vrsqrt.f32 %v1353_v37  ;;  %v1352_v39 = vadd.f32 1e-05, %v1350_v38 }
 0x9a3   :  { %v1366_v44 = vpop.permute.xlu0 %1365 }
 0x9a4   :  { %1914 = vrsqrt.f32 %v1352_v39 }
 0x9a7   :  { %v1586_v27 = vpop.permute.xlu0 %1585 }
 0x9af   :  { %v1913_v40 = vpop.eup %1912 }
 0x9b0   :  { %v1357_v41 = vmul.f32 %v1913_v40, %v2203_v14 }
 0x9b1   :  { %v1915_v42 = vpop.eup %1914 }
 0x9b2   :  { %v1356_v43 = vmul.f32 %v1915_v42, %v2205_v20  ;;  %v1363_v49 = vmul.f32 %v2221_v24, %v1357_v41 }
 0x9b4   :  { %v1362_v15 = vmul.f32 %v2221_v24, %v1356_v43  ;;  %v1369_v48 = vadd.f32 %v1366_v44, %v1363_v49 }
 0x9b6   :  { %v1368_v45 = vadd.f32 %v1366_v44, %v1362_v15 }
 0x9b8   :  { %1827 = vmatprep.mubr.msk.f32.mxu1 %vm40_vm0, %v1368_v45 }
 0x9b9   :  { %1828 = vmatmul.mubr.msk.f32.vlgmr.msra.gmra.mxu1 %vm40_vm0, %v1369_v48 }
 0xa79   :  { %v1829_v56 = vpop.f32.mrf.mxu1 }
 0xa7a   :  { %v1452_v57 = vadd.f32 %v1829_v56, %v1373_v55 }
 0xa7b   :  { %v1446_v58 = vpop.f32.mrf.mxu1 }
 0xa7c   :  { %v1447_v59 = vadd.f32 %v1446_v58, %v1373_v55  ;;  %v1456_v61 = vmax.f32 %v1452_v57, 0.0 }
 0xa7e   :  { %v1455_v60 = vmax.f32 %v1447_v59, 0.0 }
 0xa80   :  { %1862 = vmatprep.mubr.f32.mxu0 %v1455_v60 }
 0xa81   :  { %1863 = vmatmul.mubr.f32.vlgmr.msra.gmra.mxu0 %v1456_v61 }
 0xb41   :  { %v1864_v6 = vpop.f32.mrf.mxu0 }
 0xb42   :  { %v1549_v47 = vadd.f32 %v1864_v6, %v1476_v63 }
 0xb43   :  { %v1543_v46 = vpop.f32.mrf.mxu0 }
 0xb44   :  { %v1544_v7 = vadd.f32 %v1543_v46, %v1476_v63  ;;  %v1553_v10 = vadd.f32 %v1549_v47, %v1369_v48 }
 0xb46   :  { %v1552_v8 = vadd.f32 %v1544_v7, %v1368_v45  ;;  %v1557_v12 = vsel %vm40_vm0, %v1553_v10, 0.0 }
 0xb48   :  { %v1554_v9 = vsel %vm40_vm0, %v1552_v8, 0.0 }
 0xb49   :  { %1555 = vadd.xlane.f32.xlu1 %v1554_v9 }
 0xb4d   :  { %1558 = vadd.xlane.f32.xlu1 %v1557_v12 }
 0xbd2   :  { %v1556_v14 = vpop.xlane.xlu1 %1555 }
 0xbd3   :  { %v1560_v18 = vmul.f32 0.03125, %v1556_v14 }
 0xbd5   :  { %v1562_v5 = vsub.f32 %v1552_v8, %v1560_v18 }
 0xbd6   :  { %v1559_v20 = vpop.xlane.xlu1 %1558 }
 0xbd7   :  { %v1561_v23 = vmul.f32 0.03125, %v1559_v20  ;;  %v1564_v19 = vmul.f32 %v1562_v5, %v1562_v5 }
 0xbd9   :  { %v1563_v11 = vsub.f32 %v1553_v10, %v1561_v23  ;;  %v1566_v4 = vsel %vm40_vm0, %v1564_v19, 0.0 }
 0xbdb   :  { %v1565_v2 = vmul.f32 %v1563_v11, %v1563_v11 }
 0xbdd   :  { %v1569_v13 = vsel %vm40_vm0, %v1565_v2, 0.0 }
 0xbde   :  { %1570 = vadd.xlane.f32.xlu1 %v1569_v13 }
 0xbe2   :  { %1567 = vadd.xlane.f32.xlu1 %v1566_v4 }
 0xbf3   :  { %1580 = vrot.lane.b32.xlu1 %v2221_v24, %s1945_s1  ;;  %s1920_s1 = scalar_lea.vmem %s1598_s0, 256 }
 0xbf4   :  { %p1921_p0 = scmp.ne.s32.totalorder %s1598_s0, %s1920_s1  ;;  %p1926_p2 = scmp.lt.s32.totalorder %s1920_s1, %s1920_s1 }
 0xbf6   :  { %p1927_p3 = por %p1926_p2, %p1925_p1 }
 0xbf8   :  { %p1928_p4 = pnand %p1927_p3, %p1921_p0 }
 0xc67   :  { %v1571_v36 = vpop.xlane.xlu1 %1570 }
 0xc68   :  { %v1573_v32 = vmul.f32 0.03125, %v1571_v36 }
 0xc6a   :  { %v1575_v1 = vadd.f32 1e-05, %v1573_v32 }
 0xc6b   :  { %v1568_v16 = vpop.xlane.xlu1 %1567 }
 0xc6c   :  { %1916 = vrsqrt.f32 %v1575_v1  ;;  %v1572_v3 = vmul.f32 0.03125, %v1568_v16 }
 0xc6e   :  { %v1574_v25 = vadd.f32 1e-05, %v1572_v3 }
 0xc6f   :  { %v1581_v17 = vpop.permute.xlu1 %1580 }
 0xc70   :  { %1918 = vrsqrt.f32 %v1574_v25 }
 0xc79   :  { %v1917_v0 = vpop.eup %1916 }
 0xc7a   :  { %v1579_v26 = vmul.f32 %v1917_v0, %v1563_v11 }
 0xc7c   :  { %v1584_v21 = vmul.f32 %v1581_v17, %v1579_v26 }
 0xc7d   :  { %v1919_v22 = vpop.eup %1918 }
 0xc7e   :  { %v1578_v28 = vmul.f32 %v1919_v22, %v1562_v5  ;;  %v1589_v29 = vadd.f32 %v1586_v27, %v1584_v21 }
 0xc80   :  { %v1583_v30 = vmul.f32 %v1581_v17, %v1578_v28  ;;  %1591 = vst.msk [vmem:[#allocation2 + $0x8] sm:$0xff] %vm40_vm0, %v1589_v29 }
 0xc82   :  { %v1588_v24 = vadd.f32 %v1586_v27, %v1583_v30 }
 0xc84   :  { %1590 = vst.msk [vmem:[#allocation2] sm:$0xff] %vm40_vm0, %v1588_v24 }
 0xc85   :  { %1931 = shalt.err (!%p1928_p4)
}
 0xc86   :  { %s1955_s4 = smov 128   ;;  %s1956_s15 = smov 8  }
 0xc87   :  { %1603 = dma.vmem_to_hbm [thread:$0]  %s1598_s0, 256, %s2307_s5, [#allocation3], %s1955_s4, %s1955_s4, %s1956_s15  }
 0xc88   :  { %1940 = dma.done.wait [#allocation3], 256  }
 0xc89   :  { %1941 = vsyncadd [#allocation3], 4294967040 }
 0xc8a   :  { %1607 = vsyncpa [#allocation3], 1 }

</bundles_post_ra>
